<compile_context>
chip_gen: v7x
topology: tpu7x:2x2x1
jax: 0.10.0
libtpu: 0.0.40
codegen_flags: <defaults>
</compile_context>

<pallas_src>
import jax
import jax.numpy as jnp
from jax.experimental import pallas as pl
from jax.experimental.pallas import tpu as pltpu

LANE = 128
ROW_ALIGN = 16  # bf16 sublane packing for the activation cast


def _round_up(n, m):
    return ((n + m - 1) // m) * m


def _cdiv(a, b):
    return (a + b - 1) // b


# --------------------------------------------------------------------------- #
# Fused kernel: whole MLP in one body; intermediates never hit HBM.
# --------------------------------------------------------------------------- #
def _fused_mlp_kernel(x_ref, *refs):
    """refs = (w0, b0, w1, b1, ..., wL, bL, o_ref).

    Hidden layers: y = relu(x @ W + b); final layer: sigmoid(x @ W + b).
    W is bf16 (MXU-native); accumulation is f32; bias/ReLU/sigmoid are f32.
    """
    o_ref = refs[-1]
    wb = refs[:-1]
    n_layers = len(wb) // 2

    h = x_ref[...]  # f32 (tm, pd0)
    for l in range(n_layers):
        w = wb[2 * l][...]          # bf16 (pdin, pdout)
        b = wb[2 * l + 1][...]      # f32  (1, pdout) -> broadcasts over rows
        h = jnp.dot(h.astype(jnp.bfloat16), w,
                    preferred_element_type=jnp.float32) + b
        if l < n_layers - 1:
            h = jnp.maximum(h, 0.0)                       # ReLU (VPU, f32)
        else:
            e = jnp.exp(-h)                               # EUP
            h = pl.reciprocal(1.0 + e, approx=True)       # sigmoid, EUP recip
    o_ref[...] = h.astype(o_ref.dtype)


# --------------------------------------------------------------------------- #
# One-time parameter preparation (pad to lane multiples, cast weights to bf16).
# --------------------------------------------------------------------------- #
def prepare_reconstruction_decoder_params(params):
    """params: list of (w (din, dout) f32, b (dout,) f32) per linear layer.

    Returns a cached pytree: padded bf16 weights, padded f32 biases, dims.
    Do this ONCE per model, not per forward call.
    """
    dims = [params[0][0].shape[0]] + [w.shape[1] for w, _ in params]
    pdims = [max(LANE, _round_up(d, LANE)) for d in dims]
    padded = []
    for i, (w, b) in enumerate(params):
        din, dout = w.shape
        pdin, pdout = pdims[i], pdims[i + 1]
        wp = jnp.zeros((pdin, pdout), jnp.bfloat16).at[:din, :dout].set(
            w.astype(jnp.bfloat16))
        bp = jnp.zeros((1, pdout), jnp.float32).at[:, :dout].set(
            b.astype(jnp.float32).reshape(1, dout))
        padded.append((wp, bp))
    return {"weights": padded, "dims": tuple(dims), "pdims": tuple(pdims)}


# --------------------------------------------------------------------------- #
# Wrapper: batch tiling, BlockSpecs, VMEM budget, pallas_call.
# --------------------------------------------------------------------------- #
def reconstruction_decoder_forward(x, prepared, *, max_tile_rows=256):
    """x: (B, z_dim) f32; prepared: output of prepare_reconstruction_decoder_params
    (a raw [(w, b), ...] list is also accepted and prepared on the fly).

    Hidden layers use ReLU, the last layer uses Sigmoid (matches the module).
    Returns (B, x_dim) f32.
    """
    if not isinstance(prepared, dict):
        prepared = prepare_reconstruction_decoder_params(prepared)
    dims, pdims = prepared["dims"], prepared["pdims"]
    padded_wb = prepared["weights"]

    B, z_dim = x.shape
    assert z_dim == dims[0], (z_dim, dims[0])
    x_dim = dims[-1]

    # Padding-aware tile selection: minimize wasted rows, keep tm a multiple
    # of 16 (bf16 sublane pack), and force >= 2 (even) grid steps for batches
    # big enough to split across v7x's two TensorCores.
    n_tiles = max(1, _cdiv(B, max_tile_rows))
    if B > ROW_ALIGN and n_tiles < 2:
        n_tiles = 2
    if n_tiles > 1 and n_tiles % 2:
        n_tiles += 1
    tm = _round_up(_cdiv(B, n_tiles), ROW_ALIGN)
    b_pad = n_tiles * tm

    xp = jnp.zeros((b_pad, pdims[0]), jnp.float32).at[:B, :z_dim].set(x)

    grid = (n_tiles,)

    in_specs = [pl.BlockSpec((tm, pdims[0]), lambda i: (i, 0))]
    flat_wb = []
    for wp, bp in padded_wb:
        # Constant block index -> weights/biases stay resident in VMEM.
        in_specs.append(pl.BlockSpec(wp.shape, lambda i: (0, 0)))
        in_specs.append(pl.BlockSpec(bp.shape, lambda i: (0, 0)))
        flat_wb += [wp, bp]
    out_specs = pl.BlockSpec((tm, pdims[-1]), lambda i: (i, 0))

    # Explicit VMEM budget (v7x has only 64 MiB physical / 32 MiB default
    # scoped): 2x-buffered weights + 2x-buffered I/O tiles + activation slack.
    weight_bytes = sum(2 * w.size + 4 * b.size for w, b in padded_wb)
    io_bytes = 2 * (tm * pdims[0] * 4) + 2 * (tm * pdims[-1] * 4)
    act_bytes = tm * max(pdims) * (4 + 2)        # f32 h + bf16 dot-input copy
    footprint = 2 * weight_bytes + io_bytes + act_bytes
    vmem_limit = int(min(max(2 * footprint + (4 << 20), 32 << 20), 100 << 20))

    # Advisory cost estimate using the PADDED sizes actually processed.
    flops = 2 * b_pad * sum(pdims[i] * pdims[i + 1] for i in range(len(pdims) - 1))
    bytes_accessed = (
        4 * b_pad * pdims[0]
        + sum(2 * w.size + 4 * b.size for w, b in padded_wb)
        + 4 * b_pad * pdims[-1]
    )
    cost = pl.CostEstimate(
        flops=int(flops),
        transcendentals=int(b_pad * pdims[-1]),   # exp in the final sigmoid
        bytes_accessed=int(bytes_accessed),
    )

    out = pl.pallas_call(
        _fused_mlp_kernel,
        out_shape=jax.ShapeDtypeStruct((b_pad, pdims[-1]), jnp.float32),
        grid=grid,
        in_specs=in_specs,
        out_specs=out_specs,
        compiler_params=pltpu.CompilerParams(
            dimension_semantics=("parallel",),
            vmem_limit_bytes=vmem_limit,
        ),
        cost_estimate=cost,
    )(xp, *flat_wb)

    # Slice off batch/lane padding.
    return out[:B, :x_dim]


# --------------------------------------------------------------------------- #
# Parameter construction (mimics torch.nn.Linear default init) + reference.
# --------------------------------------------------------------------------- #
def init_linear_params(key, in_dim, out_dim):
    kw, kb = jax.random.split(key)
    bound = 1.0 / jnp.sqrt(jnp.float32(in_dim))
    w = jax.random.uniform(kw, (in_dim, out_dim), jnp.float32, -bound, bound)
    b = jax.random.uniform(kb, (out_dim,), jnp.float32, -bound, bound)
    return w, b


def make_reconstruction_decoder_params(key, dims):
    """dims = [z_dim, h_dim(list), x_dim] -> list of (w, b) per linear layer."""
    z_dim, h_dim, x_dim = dims
    neurons = [z_dim, *h_dim, x_dim]
    keys = jax.random.split(key, len(neurons) - 1)
    return [
        init_linear_params(keys[i], neurons[i], neurons[i + 1])
        for i in range(len(neurons) - 1)
    ]


def reconstruction_decoder_reference(x, params):
    """Plain-JAX f32 reference for correctness checking."""
    n = len(params)
    for i, (w, b) in enumerate(params):
        x = x @ w + b
        if i < n - 1:
            x = jnp.maximum(x, 0.0)
        else:
            x = jax.nn.sigmoid(x)
    return x


if __name__ == "__main__":
    # Small shapes consistent with the module: z_dim -> h_dim -> x_dim MLP.
    batch = 2
    z_dim = 8
    h_dim = [32, 16]
    x_dim = 64
    dims = [z_dim, h_dim, x_dim]

    key = jax.random.PRNGKey(0)
    k_params, k_x = jax.random.split(key)
    params = make_reconstruction_decoder_params(k_params, dims)
    x = jax.random.normal(k_x, (batch, z_dim), jnp.float32)

    # Pad/cast the parameters ONCE, reuse across forward calls.
    prepared = prepare_reconstruction_decoder_params(params)

    out = reconstruction_decoder_forward(x, prepared)
    out = jax.block_until_ready(out)

    ref = reconstruction_decoder_reference(x, params)
    assert out.shape == (batch, x_dim)
    # bf16 matmul inputs (f32 accumulation) + approx reciprocal -> loosen tol.
    assert jnp.allclose(out, ref, atol=2e-2, rtol=2e-2), (
        float(jnp.max(jnp.abs(out - ref))))

    print("KERNEL_OK")
</pallas_src>

<mosaic_0001>
module attributes {stable_mosaic.version = 11 : i64} {
  func.func @_fused_mlp_kernel(%arg0: i32, %arg1: memref<16x128xf32, #tpu.memory_space<vmem>>, %arg2: memref<128x128xbf16, #tpu.memory_space<vmem>>, %arg3: memref<1x128xf32, #tpu.memory_space<vmem>>, %arg4: memref<128x128xbf16, #tpu.memory_space<vmem>>, %arg5: memref<1x128xf32, #tpu.memory_space<vmem>>, %arg6: memref<128x128xbf16, #tpu.memory_space<vmem>>, %arg7: memref<1x128xf32, #tpu.memory_space<vmem>>, %arg8: memref<16x128xf32, #tpu.memory_space<vmem>>) attributes {dimension_semantics = [#tpu.dimension_semantics<parallel>], iteration_bounds = array<i64: 1>, scalar_prefetch = 0 : i64, scratch_operands = 0 : i64, tpu.core_type = #tpu.core_type<tc>, window_params = [{transform_indices = @transform_0, window_bounds = array<i64: 16, 128>}, {pipeline_mode = #tpu.pipeline_mode<synchronous>, transform_indices = @transform_1, window_bounds = array<i64: 128, 128>}, {pipeline_mode = #tpu.pipeline_mode<synchronous>, transform_indices = @transform_2, window_bounds = array<i64: 1, 128>}, {pipeline_mode = #tpu.pipeline_mode<synchronous>, transform_indices = @transform_3, window_bounds = array<i64: 128, 128>}, {pipeline_mode = #tpu.pipeline_mode<synchronous>, transform_indices = @transform_4, window_bounds = array<i64: 1, 128>}, {pipeline_mode = #tpu.pipeline_mode<synchronous>, transform_indices = @transform_5, window_bounds = array<i64: 128, 128>}, {pipeline_mode = #tpu.pipeline_mode<synchronous>, transform_indices = @transform_6, window_bounds = array<i64: 1, 128>}, {transform_indices = @transform_7, window_bounds = array<i64: 16, 128>}]} {
    %c0 = arith.constant 0 : index
    %c0_0 = arith.constant 0 : index
    %0 = vector.load %arg1[%c0, %c0_0] : memref<16x128xf32, #tpu.memory_space<vmem>>, vector<16x128xf32>
    %c0_1 = arith.constant 0 : index
    %c0_2 = arith.constant 0 : index
    %1 = vector.load %arg2[%c0_1, %c0_2] : memref<128x128xbf16, #tpu.memory_space<vmem>>, vector<128x128xbf16>
    %c0_3 = arith.constant 0 : index
    %c0_4 = arith.constant 0 : index
    %2 = vector.load %arg3[%c0_3, %c0_4] : memref<1x128xf32, #tpu.memory_space<vmem>>, vector<1x128xf32>
    %3 = arith.truncf %0 : vector<16x128xf32> to vector<16x128xbf16>
    %cst = arith.constant dense<0.000000e+00> : vector<16x128xf32>
    %4 = tpu.matmul %3, %1, %cst {dimension_numbers = #tpu.dot_dimension_numbers<[1], [0], [0], [1], [0, 0, 1, 1], [], []>} : vector<16x128xbf16>, vector<128x128xbf16>, vector<16x128xf32> -> vector<16x128xf32>
    %5 = vector.broadcast %2 : vector<1x128xf32> to vector<16x128xf32>
    %6 = arith.addf %4, %5 : vector<16x128xf32>
    %cst_5 = arith.constant 0.000000e+00 : f32
    %7 = vector.broadcast %cst_5 : f32 to vector<16x128xf32>
    %8 = arith.maximumf %6, %7 : vector<16x128xf32>
    %c0_6 = arith.constant 0 : index
    %c0_7 = arith.constant 0 : index
    %9 = vector.load %arg4[%c0_6, %c0_7] : memref<128x128xbf16, #tpu.memory_space<vmem>>, vector<128x128xbf16>
    %c0_8 = arith.constant 0 : index
    %c0_9 = arith.constant 0 : index
    %10 = vector.load %arg5[%c0_8, %c0_9] : memref<1x128xf32, #tpu.memory_space<vmem>>, vector<1x128xf32>
    %11 = arith.truncf %8 : vector<16x128xf32> to vector<16x128xbf16>
    %cst_10 = arith.constant dense<0.000000e+00> : vector<16x128xf32>
    %12 = tpu.matmul %11, %9, %cst_10 {dimension_numbers = #tpu.dot_dimension_numbers<[1], [0], [0], [1], [0, 0, 1, 1], [], []>} : vector<16x128xbf16>, vector<128x128xbf16>, vector<16x128xf32> -> vector<16x128xf32>
    %13 = vector.broadcast %10 : vector<1x128xf32> to vector<16x128xf32>
    %14 = arith.addf %12, %13 : vector<16x128xf32>
    %cst_11 = arith.constant 0.000000e+00 : f32
    %15 = vector.broadcast %cst_11 : f32 to vector<16x128xf32>
    %16 = arith.maximumf %14, %15 : vector<16x128xf32>
    %c0_12 = arith.constant 0 : index
    %c0_13 = arith.constant 0 : index
    %17 = vector.load %arg6[%c0_12, %c0_13] : memref<128x128xbf16, #tpu.memory_space<vmem>>, vector<128x128xbf16>
    %c0_14 = arith.constant 0 : index
    %c0_15 = arith.constant 0 : index
    %18 = vector.load %arg7[%c0_14, %c0_15] : memref<1x128xf32, #tpu.memory_space<vmem>>, vector<1x128xf32>
    %19 = arith.truncf %16 : vector<16x128xf32> to vector<16x128xbf16>
    %cst_16 = arith.constant dense<0.000000e+00> : vector<16x128xf32>
    %20 = tpu.matmul %19, %17, %cst_16 {dimension_numbers = #tpu.dot_dimension_numbers<[1], [0], [0], [1], [0, 0, 1, 1], [], []>} : vector<16x128xbf16>, vector<128x128xbf16>, vector<16x128xf32> -> vector<16x128xf32>
    %21 = vector.broadcast %18 : vector<1x128xf32> to vector<16x128xf32>
    %22 = arith.addf %20, %21 : vector<16x128xf32>
    %cst_17 = arith.constant 0.000000e+00 : f32
    %23 = vector.broadcast %cst_17 : f32 to vector<16x128xf32>
    %24 = arith.subf %23, %22 : vector<16x128xf32>
    %25 = math.exp %24 : vector<16x128xf32>
    %cst_18 = arith.constant 1.000000e+00 : f32
    %26 = vector.broadcast %cst_18 : f32 to vector<16x128xf32>
    %27 = arith.addf %26, %25 : vector<16x128xf32>
    %28 = tpu.reciprocal %27 {approx = true} : vector<16x128xf32> -> vector<16x128xf32>
    %c0_19 = arith.constant 0 : index
    %c0_20 = arith.constant 0 : index
    %29 = vector.load %arg8[%c0_19, %c0_20] : memref<16x128xf32, #tpu.memory_space<vmem>>, vector<16x128xf32>
    tpu.vector_store %arg8[%c0_19, %c0_20], %28 {strides = array<i32>} : memref<16x128xf32, #tpu.memory_space<vmem>>, vector<16x128xf32>,
    return
  }
  func.func @transform_0(%arg0: i32) -> (i32, i32) {
    %c0_i32 = arith.constant 0 : i32
    %c0_i32_0 = arith.constant 0 : i32
    return %arg0, %c0_i32 : i32, i32
  }
  func.func @transform_1(%arg0: i32) -> (i32, i32) {
    %c0_i32 = arith.constant 0 : i32
    %c0_i32_0 = arith.constant 0 : i32
    %c0_i32_1 = arith.constant 0 : i32
    return %c0_i32, %c0_i32_0 : i32, i32
  }
  func.func @transform_2(%arg0: i32) -> (i32, i32) {
    %c0_i32 = arith.constant 0 : i32
    %c0_i32_0 = arith.constant 0 : i32
    %c0_i32_1 = arith.constant 0 : i32
    return %c0_i32, %c0_i32_0 : i32, i32
  }
  func.func @transform_3(%arg0: i32) -> (i32, i32) {
    %c0_i32 = arith.constant 0 : i32
    %c0_i32_0 = arith.constant 0 : i32
    %c0_i32_1 = arith.constant 0 : i32
    return %c0_i32, %c0_i32_0 : i32, i32
  }
  func.func @transform_4(%arg0: i32) -> (i32, i32) {
    %c0_i32 = arith.constant 0 : i32
    %c0_i32_0 = arith.constant 0 : i32
    %c0_i32_1 = arith.constant 0 : i32
    return %c0_i32, %c0_i32_0 : i32, i32
  }
  func.func @transform_5(%arg0: i32) -> (i32, i32) {
    %c0_i32 = arith.constant 0 : i32
    %c0_i32_0 = arith.constant 0 : i32
    %c0_i32_1 = arith.constant 0 : i32
    return %c0_i32, %c0_i32_0 : i32, i32
  }
  func.func @transform_6(%arg0: i32) -> (i32, i32) {
    %c0_i32 = arith.constant 0 : i32
    %c0_i32_0 = arith.constant 0 : i32
    %c0_i32_1 = arith.constant 0 : i32
    return %c0_i32, %c0_i32_0 : i32, i32
  }
  func.func @transform_7(%arg0: i32) -> (i32, i32) {
    %c0_i32 = arith.constant 0 : i32
    %c0_i32_0 = arith.constant 0 : i32
    return %arg0, %c0_i32 : i32, i32
  }
}

</mosaic_0001>

<bundles_post_ra>
// kernel: tpu_custom_call.1
= control target key start
LH: loop header
LB: loop body
LE: loop exit
PB: predicated region body
PF: predicated region fallthrough
CT: control target
= control target key end

     0   :  { %12 = vsyncpa [#allocation3], 0  ;;  %s906_s0 = inlined_call_operand.hbm [shape: f32[16,128], index: 0, kind: input, shape index: {}]   ;;  %s907_s1 = inlined_call_operand.hbm [shape: bf16[128,128], index: 1, kind: input, shape index: {}]   ;;  %s908_s2 = inlined_call_operand.vmem [shape: f32[1,128], index: 2, kind: input, shape index: {}]   ;;  %s909_s3 = inlined_call_operand.hbm [shape: bf16[128,128], index: 3, kind: input, shape index: {}]   ;;  %s910_s4 = inlined_call_operand.vmem [shape: f32[1,128], index: 4, kind: input, shape index: {}]   ;;  %s911_s5 = inlined_call_operand.hbm [shape: bf16[128,128], index: 5, kind: input, shape index: {}]   ;;  %s912_s6 = inlined_call_operand.vmem [shape: f32[1,128], index: 6, kind: input, shape index: {}]   ;;  %s913_s7 = inlined_call_operand.hbm [shape: f32[16,128], index: 7, kind: output, shape index: {}]  }
   0x1   :  { %13 = vsyncpa [#allocation6], 0 }
   0x2   :  { %14 = vsyncpa [#allocation9], 0 }
   0x3   :  { %15 = vsyncpa [#allocation4], 0  ;;  %s734_s24 = smov [#allocation5]   ;;  %s616_s28 = scalar_lea.hbm %s907_s1, 1024 }
   0x4   :  { %s33_s25 = sshll.u32 %s734_s24, 4  ;;  %p617_p0 = scmp.ne.s32.totalorder %s907_s1, %s616_s28  ;;  %s34_s25 = int_to_ptr.vmem [resolvable:$true] %s33_s25 }
   0x5   :  { %p620_p1 = scmp.lt.u32.totalorder %s616_s28, %s907_s1 }
   0x7   :  { %p622_p2 = pnand %p620_p1, %p617_p0 }
   0x9   :  { %625 = shalt.err (!%p622_p2)
}
   0xa   :  { %s626_s10 = scalar_lea.vmem %s34_s25, 1024  ;;  %p631_p4 = scmp.lt.s32.totalorder %s34_s25, %s34_s25 }
   0xb   :  { %p627_p3 = scmp.ne.s32.totalorder %s34_s25, %s626_s10  ;;  %p632_p5 = scmp.lt.s32.totalorder %s626_s10, %s626_s10 }
   0xd   :  { %p633_p6 = por %p632_p5, %p631_p4 }
   0xf   :  { %p634_p7 = pnand %p633_p6, %p627_p3 }
  0x11   :  { %637 = shalt.err (!%p634_p7)
}
  0x12   :  { %s735_s11 = smov 64   ;;  %s736_s12 = smov 4  }
  0x13   :  { %39 = dma.hbm_to_vmem [thread:$0]  %s907_s1, 1024, %s34_s25, [#allocation6], %s735_s11, %s735_s11, %s736_s12  }
  0x14   :  { %s737_s15 = smov [#allocation2]   ;;  %s638_s19 = scalar_lea.hbm %s906_s0, 256 }
  0x15   :  { %s21_s16 = sshll.u32 %s737_s15, 4  ;;  %p639_p8 = scmp.ne.s32.totalorder %s906_s0, %s638_s19  ;;  %s22_s16 = int_to_ptr.vmem [resolvable:$true] %s21_s16 }
  0x16   :  { %p642_p9 = scmp.lt.u32.totalorder %s638_s19, %s906_s0 }
  0x18   :  { %p644_p10 = pnand %p642_p9, %p639_p8 }
  0x1a   :  { %647 = shalt.err (!%p644_p10)
}
  0x1b   :  { %s648_s24 = scalar_lea.vmem %s22_s16, 256  ;;  %p653_p12 = scmp.lt.s32.totalorder %s22_s16, %s22_s16 }
  0x1c   :  { %p649_p11 = scmp.ne.s32.totalorder %s22_s16, %s648_s24  ;;  %p654_p13 = scmp.lt.s32.totalorder %s648_s24, %s648_s24 }
  0x1e   :  { %p655_p0 = por %p654_p13, %p653_p12 }
  0x20   :  { %p656_p1 = pnand %p655_p0, %p649_p11 }
  0x22   :  { %659 = shalt.err (!%p656_p1)
}
  0x23   :  { %s738_s1 = smov 128   ;;  %s739_s25 = smov 8  }
  0x24   :  { %27 = dma.hbm_to_vmem [thread:$0]  %s906_s0, 256, %s22_s16, [#allocation3], %s738_s1, %s738_s1, %s739_s25  }
  0x25   :  { %s740_s28 = smov [#allocation7]   ;;  %s741_s30 = smov [#allocation8]  }
  0x26   :  { %s47_s29 = sshll.u32 %s740_s28, 4  ;;  %s61_s8 = sshll.u32 %s741_s30, 4  ;;  %s48_s29 = int_to_ptr.vmem [resolvable:$true] %s47_s29  ;;  %s815_s8 = int_to_ptr.vmem [resolvable:$true] %s61_s8 }
  0x27   :  { %s660_s13 = scalar_lea.hbm %s909_s3, 1024 }
  0x28   :  { %p661_p2 = scmp.ne.s32.totalorder %s909_s3, %s660_s13  ;;  %p664_p3 = scmp.lt.u32.totalorder %s660_s13, %s909_s3 }
  0x2a   :  { %p666_p4 = pnand %p664_p3, %p661_p2 }
  0x2c   :  { %669 = shalt.err (!%p666_p4)
}
  0x2d   :  { %s670_s0 = scalar_lea.vmem %s48_s29, 1024  ;;  %p675_p6 = scmp.lt.s32.totalorder %s48_s29, %s48_s29 }
  0x2e   :  { %p671_p5 = scmp.ne.s32.totalorder %s48_s29, %s670_s0  ;;  %p676_p7 = scmp.lt.s32.totalorder %s670_s0, %s670_s0 }
  0x30   :  { %p677_p8 = por %p676_p7, %p675_p6 }
  0x32   :  { %p678_p9 = pnand %p677_p8, %p671_p5 }
  0x34   :  { %681 = shalt.err (!%p678_p9)
}
  0x35   :  { %53 = dma.hbm_to_vmem [thread:$0]  %s909_s3, 1024, %s48_s29, [#allocation6], %s735_s11, %s735_s11, %s736_s12  }
  0x36   :  { %s682_s22 = scalar_lea.hbm %s911_s5, 1024 }
  0x37   :  { %p683_p10 = scmp.ne.s32.totalorder %s911_s5, %s682_s22  ;;  %p686_p11 = scmp.lt.u32.totalorder %s682_s22, %s911_s5 }
  0x39   :  { %p688_p12 = pnand %p686_p11, %p683_p10 }
  0x3b   :  { %691 = shalt.err (!%p688_p12)
}
  0x3c   :  { %s692_s28 = scalar_lea.vmem %s815_s8, 1024  ;;  %p697_p0 = scmp.lt.s32.totalorder %s815_s8, %s815_s8 }
  0x3d   :  { %p693_p13 = scmp.ne.s32.totalorder %s815_s8, %s692_s28  ;;  %p698_p1 = scmp.lt.s32.totalorder %s692_s28, %s692_s28 }
  0x3f   :  { %p699_p2 = por %p698_p1, %p697_p0 }
  0x41   :  { %p700_p3 = pnand %p699_p2, %p693_p13 }
  0x43   :  { %703 = shalt.err (!%p700_p3)
}
  0x44   :  { %67 = dma.hbm_to_vmem [thread:$0]  %s911_s5, 1024, %s815_s8, [#allocation9], %s735_s11, %s735_s11, %s736_s12  }
  0x45   :  { %726 = dma.done.wait [#allocation3], 256  }
  0x46   :  { %727 = vsyncadd [#allocation3], 4294967040 }
  0x47   :  { %728 = dma.done.wait [#allocation6], 2048  }
  0x48   :  { %729 = vsyncadd [#allocation6], 4294965248 }
  0x49   :  { %730 = dma.done.wait [#allocation9], 1024  }
  0x4a   :  { %731 = vsyncadd [#allocation9], 4294966272  ;;  %v742_v0 = vmov 0.0   ;;  %vm743_vm0 = vmmov 0   ;;  %v584_v1 = vld [vmem:[#allocation5] sm:$0xff]   ;;  %v585_v2 = vld [vmem:[#allocation5 + $0x8] sm:$0xff]  }
  0x4b   :  { %513 = vmatprep.subr.bf16.mxu0 %v742_v0  ;;  %529 = vmatprep.mubr.msk.bf16.mxu0 %vm743_vm0, %v742_v0  ;;  %v586_v3 = vld [vmem:[#allocation5 + $0x10] sm:$0xff]   ;;  %v592_v4 = vld [vmem:[#allocation7] sm:$0xff]   ;;  %v587_v5 = vld [vmem:[#allocation5 + $0x18] sm:$0xff]  }
  0x4c   :  { %533 = vmatprep.subr.bf16.mxu1 %v742_v0  ;;  %549 = vmatprep.mubr.msk.bf16.mxu1 %vm743_vm0, %v742_v0  ;;  %v593_v6 = vld [vmem:[#allocation7 + $0x8] sm:$0xff]   ;;  %v588_v7 = vld [vmem:[#allocation5 + $0x20] sm:$0xff]   ;;  %v594_v8 = vld [vmem:[#allocation7 + $0x10] sm:$0xff]  }
  0x4d   :  { %514 = vmatpush3.bf16.msra.mxu0 %v584_v1  ;;  %534 = vmatpush3.bf16.msra.mxu1 %v592_v4  ;;  %v589_v9 = vld [vmem:[#allocation5 + $0x28] sm:$0xff]   ;;  %v595_v10 = vld [vmem:[#allocation7 + $0x18] sm:$0xff]   ;;  %v590_v11 = vld [vmem:[#allocation5 + $0x30] sm:$0xff]  }
  0x4e   :  { %515 = vmatprep.subr.bf16.mxu0 %v742_v0  ;;  %535 = vmatprep.subr.bf16.mxu1 %v742_v0  ;;  %v596_v12 = vld [vmem:[#allocation7 + $0x20] sm:$0xff]   ;;  %v591_v13 = vld [vmem:[#allocation5 + $0x38] sm:$0xff]   ;;  %v83_v14 = vld [vmem:[#allocation2] sm:$0xff] }
  0x4f   :  { %v84_v15 = vld [vmem:[#allocation2 + $0x8] sm:$0xff]  ;;  %v597_v16 = vld [vmem:[#allocation7 + $0x28] sm:$0xff]   ;;  %v598_v18 = vld [vmem:[#allocation7 + $0x30] sm:$0xff]  }
  0x50   :  { %v102_v17 = vpack.c.bf16 %v84_v15, %v83_v14  ;;  %v599_v19 = vld [vmem:[#allocation7 + $0x38] sm:$0xff]   ;;  %v600_v20 = vld [vmem:[#allocation8] sm:$0xff]   ;;  %v601_v21 = vld [vmem:[#allocation8 + $0x8] sm:$0xff]  }
  0x51   :  { %516 = vmatpush3.bf16.msra.mxu0 %v585_v2  ;;  %536 = vmatpush3.bf16.msra.mxu1 %v593_v6  ;;  %v602_v22 = vld [vmem:[#allocation8 + $0x10] sm:$0xff]   ;;  %v603_v23 = vld [vmem:[#allocation8 + $0x18] sm:$0xff]   ;;  %v604_v24 = vld [vmem:[#allocation8 + $0x20] sm:$0xff]  }
  0x52   :  { %517 = vmatprep.subr.bf16.mxu0 %v742_v0  ;;  %537 = vmatprep.subr.bf16.mxu1 %v742_v0  ;;  %v605_v25 = vld [vmem:[#allocation8 + $0x28] sm:$0xff]   ;;  %v459_v26 = vld [vmem:[%s908_s2] ss:$0 sm:$0xff]  ;;  %v607_v37 = vld [vmem:[#allocation8 + $0x38] sm:$0xff]  }
  0x53   :  { %v606_v36 = vld [vmem:[#allocation8 + $0x30] sm:$0xff]  }
  0x54   :  { %v468_v38 = vld [vmem:[%s910_s4] ss:$0 sm:$0xff]  ;;  %s744_s4 = smov [#allocation10]  }
  0x55   :  { %518 = vmatpush3.bf16.msra.mxu0 %v586_v3  ;;  %538 = vmatpush3.bf16.msra.mxu1 %v594_v8  ;;  %v477_v48 = vld [vmem:[%s912_s6] ss:$0 sm:$0xff]  ;;  %s445_s6 = sshll.u32 %s744_s4, 4  ;;  %s446_s6 = int_to_ptr.vmem [resolvable:$true] %s445_s6 }
  0x56   :  { %519 = vmatprep.subr.bf16.mxu0 %v742_v0  ;;  %539 = vmatprep.subr.bf16.mxu1 %v742_v0  ;;  %s704_s9 = scalar_lea.vmem %s446_s6, 256  ;;  %p709_p5 = scmp.lt.s32.totalorder %s446_s6, %s446_s6 }
  0x57   :  { %p705_p4 = scmp.ne.s32.totalorder %s446_s6, %s704_s9  ;;  %p710_p6 = scmp.lt.s32.totalorder %s704_s9, %s704_s9 }
  0x59   :  { %520 = vmatpush3.bf16.msra.mxu0 %v587_v5  ;;  %540 = vmatpush3.bf16.msra.mxu1 %v595_v10  ;;  %p711_p7 = por %p710_p6, %p709_p5 }
  0x5a   :  { %521 = vmatprep.subr.bf16.mxu0 %v742_v0  ;;  %541 = vmatprep.subr.bf16.mxu1 %v742_v0 }
  0x5b   :  { %p712_p8 = pnand %p711_p7, %p705_p4 }
  0x5d   :  { %522 = vmatpush3.bf16.msra.mxu0 %v588_v7  ;;  %542 = vmatpush3.bf16.msra.mxu1 %v596_v12 }
  0x5e   :  { %523 = vmatprep.subr.bf16.mxu0 %v742_v0  ;;  %543 = vmatprep.subr.bf16.mxu1 %v742_v0 }
  0x61   :  { %524 = vmatpush3.bf16.msra.mxu0 %v589_v9  ;;  %544 = vmatpush3.bf16.msra.mxu1 %v597_v16 }
  0x62   :  { %525 = vmatprep.subr.bf16.mxu0 %v742_v0  ;;  %545 = vmatprep.subr.bf16.mxu1 %v742_v0 }
  0x65   :  { %526 = vmatpush3.bf16.msra.mxu0 %v590_v11  ;;  %546 = vmatpush3.bf16.msra.mxu1 %v598_v18 }
  0x66   :  { %527 = vmatprep.subr.bf16.mxu0 %v742_v0  ;;  %547 = vmatprep.subr.bf16.mxu1 %v742_v0 }
  0x69   :  { %528 = vmatpush3.bf16.msra.mxu0 %v591_v13  ;;  %548 = vmatpush3.bf16.msra.mxu1 %v599_v19 }
  0x6a   :  { %553 = vmatprep.subr.bf16.mxu0 %v742_v0 }
  0x6c   :  { %530 = vmatmul.mubr.bf16.vlgmr.msra.gmra.mrb[0].mxu0 %v102_v17 }
  0x6d   :  { %569 = vmatprep.mubr.msk.bf16.mxu0 %vm743_vm0, %v742_v0  ;;  %554 = vmatpush3.bf16.msra.mxu0 %v600_v20 }
  0x6e   :  { %555 = vmatprep.subr.bf16.mxu0 %v742_v0 }
  0x71   :  { %556 = vmatpush3.bf16.msra.mxu0 %v601_v21 }
  0x72   :  { %557 = vmatprep.subr.bf16.mxu0 %v742_v0 }
  0x75   :  { %558 = vmatpush3.bf16.msra.mxu0 %v602_v22 }
  0x76   :  { %559 = vmatprep.subr.bf16.mxu0 %v742_v0 }
  0x79   :  { %560 = vmatpush3.bf16.msra.mxu0 %v603_v23 }
  0x7a   :  { %561 = vmatprep.subr.bf16.mxu0 %v742_v0 }
  0x7d   :  { %562 = vmatpush3.bf16.msra.mxu0 %v604_v24 }
  0x7e   :  { %563 = vmatprep.subr.bf16.mxu0 %v742_v0 }
  0x81   :  { %564 = vmatpush3.bf16.msra.mxu0 %v605_v25 }
  0x82   :  { %565 = vmatprep.subr.bf16.mxu0 %v742_v0 }
  0x85   :  { %566 = vmatpush3.bf16.msra.mxu0 %v606_v36 }
  0x86   :  { %567 = vmatprep.subr.bf16.mxu0 %v742_v0 }
  0x89   :  { %568 = vmatpush3.bf16.msra.mxu0 %v607_v37 }
 0x13f   :  { %v191_v27 = vpop.f32.mrb[0].mxu0 }
 0x140   :  { %v192_v28 = vadd.f32 %v459_v26, %v191_v27  ;;  %v531_v29 = vpop.f32.mrb[1].mxu0 }
 0x141   :  { %v194_v30 = vpop.f32.mrb[2].mxu0 }
 0x142   :  { %v195_v31 = vadd.f32 %v459_v26, %v194_v30  ;;  %v532_v32 = vpop.f32.mrb[3].mxu0  ;;  %v198_v33 = vmax.f32 %v192_v28, 0.0 }
 0x144   :  { %v199_v34 = vmax.f32 %v195_v31, 0.0 }
 0x146   :  { %v217_v35 = vpack.c.bf16 %v199_v34, %v198_v33 }
 0x148   :  { %550 = vmatmul.mubr.bf16.vlgmr.msra.gmra.mrb[0].mxu1 %v217_v35 }
 0x21b   :  { %v306_v39 = vpop.f32.mrb[0].mxu1 }
 0x21c   :  { %v307_v40 = vadd.f32 %v468_v38, %v306_v39  ;;  %v551_v41 = vpop.f32.mrb[1].mxu1 }
 0x21d   :  { %v309_v42 = vpop.f32.mrb[2].mxu1 }
 0x21e   :  { %v310_v43 = vadd.f32 %v468_v38, %v309_v42  ;;  %v552_v44 = vpop.f32.mrb[3].mxu1  ;;  %v313_v45 = vmax.f32 %v307_v40, 0.0 }
 0x220   :  { %v314_v46 = vmax.f32 %v310_v43, 0.0 }
 0x222   :  { %v332_v47 = vpack.c.bf16 %v314_v46, %v313_v45 }
 0x224   :  { %570 = vmatmul.mubr.bf16.vlgmr.msra.gmra.mrb[4].mxu0 %v332_v47 }
 0x2f7   :  { %v421_v49 = vpop.f32.mrb[4].mxu0 }
 0x2f8   :  { %v422_v50 = vadd.f32 %v477_v48, %v421_v49  ;;  %v571_v51 = vpop.f32.mrb[5].mxu0 }
 0x2f9   :  { %v424_v52 = vpop.f32.mrb[6].mxu0 }
 0x2fa   :  { %v428_v53 = vsub.f32 0.0, %v422_v50  ;;  %v425_v54 = vadd.f32 %v477_v48, %v424_v52  ;;  %v572_v55 = vpop.f32.mrb[7].mxu0 }
 0x2fc   :  { %v430_v56 = vmul.f32 1.442695, %v428_v53  ;;  %v429_v57 = vsub.f32 0.0, %v425_v54 }
 0x2fe   :  { %608 = vpow2.f32 %v430_v56  ;;  %v432_v58 = vmul.f32 1.442695, %v429_v57 }
 0x300   :  { %610 = vpow2.f32 %v432_v58 }
 0x308   :  { %v609_v59 = vpop.eup %608 }
 0x309   :  { %v434_v60 = vadd.f32 1.0, %v609_v59 }
 0x30a   :  { %v611_v61 = vpop.eup %610 }
 0x30b   :  { %612 = vrcp.f32 %v434_v60  ;;  %v435_v62 = vadd.f32 1.0, %v611_v61 }
 0x30d   :  { %614 = vrcp.f32 %v435_v62 }
 0x315   :  { %v613_v63 = vpop.eup %612 }
 0x316   :  { %438 = vst [vmem:[#allocation10] sm:$0xff] %v613_v63 }
 0x317   :  { %v615_v0 = vpop.eup %614 }
 0x318   :  { %439 = vst [vmem:[#allocation10 + $0x8] sm:$0xff] %v615_v0 }
 0x319   :  { %715 = shalt.err (!%p712_p8)
}
 0x31a   :  { %s716_s14 = scalar_lea.hbm %s913_s7, 256 }
 0x31b   :  { %p717_p9 = scmp.ne.s32.totalorder %s913_s7, %s716_s14  ;;  %p720_p10 = scmp.lt.u32.totalorder %s716_s14, %s913_s7 }
 0x31d   :  { %p722_p11 = pnand %p720_p10, %p717_p9 }
 0x31f   :  { %725 = shalt.err (!%p722_p11)
}
 0x320   :  { %451 = dma.vmem_to_hbm [thread:$0]  %s446_s6, 256, %s913_s7, [#allocation4], %s738_s1, %s738_s1, %s739_s25  }
 0x321   :  { %732 = dma.done.wait [#allocation4], 256  }
 0x322   :  { %733 = vsyncadd [#allocation4], 4294967040 }
 0x323   :  { %455 = vsyncpa [#allocation3], 1 }
 0x324   :  { %456 = vsyncpa [#allocation6], 1 }
 0x325   :  { %457 = vsyncpa [#allocation9], 1 }
 0x326   :  { %458 = vsyncpa [#allocation4], 1 }

</bundles_post_ra>
